<compile_context>
chip_gen: v5e
topology: v5e:2x2
jax: 0.10.0
libtpu: 0.0.40
codegen_flags: <defaults>
</compile_context>

<pallas_src>
import functools

import jax
import jax.numpy as jnp
import numpy as np
from jax.experimental import pallas as pl
from jax.experimental.pallas import tpu as pltpu


def _residual_kernel(x_ref, w1f_ref, w2c_ref, b1_ref, b23_ref, out_ref,
                     lhs1_ref, lhs2_ref, *, k, d1, d2, p1, p2, H, H1, H2):
    """One batch element per grid step; whole image lives in VMEM.

    x_ref    : (1, H, W*Cin)            lane-dense input rows (no padding)
    w1f_ref  : (k*W*Cin, N1 + N2) bf16  conv1 Toeplitz (K=im2col) + fused 1x1
    w2c_ref  : (k*W1*Co, N2)      bf16  conv2 Toeplitz (K=im2col)
    b1_ref   : (1, N1)  f32             conv1 bias tiled over width
    b23_ref  : (1, N2)  f32             (conv2 + conv3) bias tiled over width
    lhs1_ref : (H1, k*W*Cin)  f32 VMEM  conv1 im2col LHS staging
    lhs2_ref : (H2, k*W1*Co)  f32 VMEM  conv2 im2col LHS staging
    """
    WC_in = x_ref.shape[-1]        # W  * C_in
    WC_mid = b1_ref.shape[-1]      # W1 * C_out  (= N1)
    N1 = WC_mid
    f32 = jnp.float32

    # ---- stage conv1 im2col LHS (H zero-padding materialized here) ----------
    for kh in range(k):
        src_lo = kh * d1 - p1                       # x row feeding lhs row 0
        lo_x = max(0, src_lo)
        hi_x = min(H, src_lo + H1)
        lo_l, hi_l = lo_x - src_lo, hi_x - src_lo
        c0, c1 = kh * WC_in, (kh + 1) * WC_in
        if lo_l > 0:
            lhs1_ref[0:lo_l, c0:c1] = jnp.zeros((lo_l, WC_in), f32)
        if hi_l < H1:
            lhs1_ref[hi_l:H1, c0:c1] = jnp.zeros((H1 - hi_l, WC_in), f32)
        lhs1_ref[lo_l:hi_l, c0:c1] = x_ref[0, lo_x:hi_x, :]

    # ---- conv1 (+ fused 1x1 shortcut): single bf16 MXU matmul ---------------
    z = jnp.dot(lhs1_ref[...].astype(jnp.bfloat16), w1f_ref[...],
                preferred_element_type=f32)          # (H1, N1 + N2)
    y1 = jnp.maximum(z[:, :N1] + b1_ref[...], 0.0)   # conv1 + bias + ReLU
    sc = z[:, N1:]                                   # 1x1 shortcut (pre-bias)

    # ---- stage conv2 im2col LHS (halo zeros of the 2p-padding) --------------
    for kh in range(k):
        src_lo = kh * d2 - p2
        lo_y = max(0, src_lo)
        hi_y = min(H1, src_lo + H2)
        lo_l, hi_l = lo_y - src_lo, hi_y - src_lo
        c0, c1 = kh * WC_mid, (kh + 1) * WC_mid
        if lo_l > 0:
            lhs2_ref[0:lo_l, c0:c1] = jnp.zeros((lo_l, WC_mid), f32)
        if hi_l < H2:
            lhs2_ref[hi_l:H2, c0:c1] = jnp.zeros((H2 - hi_l, WC_mid), f32)
        lhs2_ref[lo_l:hi_l, c0:c1] = y1[lo_y:hi_y, :]

    # ---- conv2: single bf16 MXU matmul; residual add + final ReLU -----------
    acc2 = jnp.dot(lhs2_ref[...].astype(jnp.bfloat16), w2c_ref[...],
                   preferred_element_type=f32)       # (H2, N2)
    out_ref[0] = jnp.maximum(acc2 + sc + b23_ref[...], 0.0).astype(out_ref.dtype)


def _build_width_toeplitz(w_kkio, w_in, w_out, dilation, padding):
    """Fold the W-axis convolution (incl. zero padding) into matmul weights.

    w_kkio: (kh, kw, Cin, Cout) conv weight.
    Returns T of shape (k, w_in*Cin, w_out*Cout) with
      T[kh, wi*Cin + ci, wo*Cout + co] = w[kh, kw, ci, co]
        where wi == wo + kw*dilation - padding (unique kw), else 0.
    """
    k_h, k_w, cin, cout = w_kkio.shape
    mats = []
    for kh in range(k_h):
        acc = jnp.zeros((w_in * cin, w_out * cout), jnp.float32)
        for kw in range(k_w):
            off = padding - kw * dilation   # wo - wi on the nonzero diagonal
            sel = jnp.eye(w_in, w_out, k=off, dtype=jnp.float32)
            blk = jnp.einsum('IW,io->IiWo', sel,
                             w_kkio[kh, kw].astype(jnp.float32))
            acc = acc + blk.reshape(w_in * cin, w_out * cout)
        mats.append(acc)
    return jnp.stack(mats)


def prepare_residual_params(params, *, H, W, kernel_size, padding, dilation):
    """One-time (per weight set) construction of the fused MXU weights."""
    k, p, d = kernel_size, padding, dilation
    p2, d2 = 2 * padding, 2 * dilation
    C_out, C_in = params["w1"].shape[0], params["w1"].shape[1]

    H1 = H + 2 * p - d * (k - 1)
    W1 = W + 2 * p - d * (k - 1)
    H2 = H1 + 2 * p2 - d2 * (k - 1)
    W2 = W1 + 2 * p2 - d2 * (k - 1)
    assert (H2, W2) == (H, W), (
        "residual add requires conv1/conv2 to preserve spatial dims")
    assert p % d == 0 and p // d < k, "1x1-shortcut fusion needs p % d == 0"

    WC_in, N1, N2 = W * C_in, W1 * C_out, W2 * C_out

    # PyTorch (Cout, Cin, kh, kw) -> (kh, kw, Cin, Cout), then Toeplitz-in-W
    # and concatenate the k H-taps along K (im2col ordering).
    w1 = jnp.transpose(params["w1"], (2, 3, 1, 0))
    w2 = jnp.transpose(params["w2"], (2, 3, 1, 0))
    w3 = jnp.transpose(params["w3"], (2, 3, 1, 0))          # (1, 1, Cin, Cout)

    t1 = _build_width_toeplitz(w1, W, W1, d, p).reshape(k * WC_in, N1)
    t2 = _build_width_toeplitz(w2, W1, W2, d2, p2).reshape(k * N1, N2)
    t3 = _build_width_toeplitz(w3, W, W2, 1, 0)[0]           # (WC_in, N2)

    # Fuse the 1x1 shortcut as extra N columns of conv1's weight: tap
    # kh3 = p // d of conv1 reads exactly the un-padded input rows.
    kh3 = p // d
    w1f = jnp.zeros((k * WC_in, N1 + N2), jnp.float32)
    w1f = w1f.at[:, :N1].set(t1)
    w1f = w1f.at[kh3 * WC_in:(kh3 + 1) * WC_in, N1:].set(t3)

    b1r = jnp.tile(params["b1"].astype(jnp.float32), W1)[None, :]
    b23r = jnp.tile((params["b2"] + params["b3"]).astype(jnp.float32),
                    W2)[None, :]

    return {
        "w1f": w1f.astype(jnp.bfloat16),   # (k*W*Cin, W1*Co + W2*Co)
        "w2c": t2.astype(jnp.bfloat16),    # (k*W1*Co, W2*Co)
        "b1": b1r,                         # (1, W1*Co) f32
        "b23": b23r,                       # (1, W2*Co) f32
    }


def residual_forward(x_nchw, prep, *, kernel_size, padding, dilation,
                     strides=1):
    """Pallas implementation of Residual.forward. x_nchw: (B, Cin, H, W)."""
    assert strides == 1, "only strides=1 is supported"
    B, C_in, H, W = x_nchw.shape
    k, p, d = kernel_size, padding, dilation
    p2, d2 = 2 * padding, 2 * dilation
    H1 = H + 2 * p - d * (k - 1)
    H2 = H1 + 2 * p2 - d2 * (k - 1)
    WC_in = W * C_in
    N1 = prep["b1"].shape[-1]
    N2 = prep["b23"].shape[-1]
    C_out = N2 // W                       # W2 == W by construction

    # NCHW -> lane-dense (B, H, W*Cin) rows.  No jnp.pad: H padding is applied
    # inside the kernel; W padding lives in the Toeplitz weights.
    x_rows = jnp.transpose(x_nchw, (0, 2, 3, 1)).astype(jnp.float32)
    x_rows = x_rows.reshape(B, H, WC_in)

    kern = functools.partial(_residual_kernel, k=k, d1=d, d2=d2, p1=p, p2=p2,
                             H=H, H1=H1, H2=H2)

    out_rows = pl.pallas_call(
        kern,
        out_shape=jax.ShapeDtypeStruct((B, H2, N2), jnp.float32),
        grid_spec=pltpu.PrefetchScalarGridSpec(
            num_scalar_prefetch=0,
            grid=(B,),
            in_specs=[
                pl.BlockSpec((1, H, WC_in), lambda b: (b, 0, 0)),
                pl.BlockSpec((k * WC_in, N1 + N2), lambda b: (0, 0)),
                pl.BlockSpec((k * N1, N2), lambda b: (0, 0)),
                pl.BlockSpec((1, N1), lambda b: (0, 0)),
                pl.BlockSpec((1, N2), lambda b: (0, 0)),
            ],
            out_specs=pl.BlockSpec((1, H2, N2), lambda b: (b, 0, 0)),
            scratch_shapes=[
                pltpu.VMEM((H1, k * WC_in), jnp.float32),  # conv1 im2col LHS
                pltpu.VMEM((H2, k * N1), jnp.float32),     # conv2 im2col LHS
            ],
        ),
        compiler_params=pltpu.CompilerParams(
            dimension_semantics=("parallel",)),
    )(x_rows, prep["w1f"], prep["w2c"], prep["b1"], prep["b23"])

    # (B, H2, W2*Cout) -> NCHW
    out_nhwc = out_rows.reshape(B, H2, W, C_out)
    return jnp.transpose(out_nhwc, (0, 3, 1, 2))


def residual_reference(x_nchw, params, *, kernel_size, padding, dilation,
                       strides=1):
    """Pure-JAX reference (lax conv) mirroring the PyTorch forward."""
    dn = ("NCHW", "OIHW", "NCHW")
    y = jax.lax.conv_general_dilated(
        x_nchw, params["w1"], (strides, strides),
        [(padding, padding), (padding, padding)],
        rhs_dilation=(dilation, dilation), dimension_numbers=dn)
    y = jax.nn.relu(y + params["b1"][None, :, None, None])
    y = jax.lax.conv_general_dilated(
        y, params["w2"], (1, 1),
        [(2 * padding, 2 * padding), (2 * padding, 2 * padding)],
        rhs_dilation=(2 * dilation, 2 * dilation), dimension_numbers=dn)
    y = y + params["b2"][None, :, None, None]
    x = jax.lax.conv_general_dilated(
        x_nchw, params["w3"], (strides, strides), [(0, 0), (0, 0)],
        dimension_numbers=dn)
    x = x + params["b3"][None, :, None, None]
    return jax.nn.relu(y + x)


if __name__ == "__main__":
    B, C_in, C_out, H, W = 2, 4, 8, 16, 16
    k, p, d, s = 5, 4, 2, 1  # see NOTE at top about the padding choice

    key = jax.random.PRNGKey(0)
    keys = jax.random.split(key, 7)

    def uinit(kk, shape, fan_in):
        bound = 1.0 / np.sqrt(fan_in)
        return jax.random.uniform(kk, shape, jnp.float32, -bound, bound)

    params = {
        "w1": uinit(keys[0], (C_out, C_in, k, k), C_in * k * k),
        "b1": uinit(keys[1], (C_out,), C_in * k * k),
        "w2": uinit(keys[2], (C_out, C_out, k, k), C_out * k * k),
        "b2": uinit(keys[3], (C_out,), C_out * k * k),
        "w3": uinit(keys[4], (C_out, C_in, 1, 1), C_in),
        "b3": uinit(keys[5], (C_out,), C_in),
    }
    x = jax.random.normal(keys[6], (B, C_in, H, W), jnp.float32)

    # Weight preprocessing hoisted out of the hot path (once per weight set).
    prep = prepare_residual_params(params, H=H, W=W, kernel_size=k, padding=p,
                                   dilation=d)
    prep = jax.tree_util.tree_map(jax.block_until_ready, prep)

    fwd = jax.jit(functools.partial(residual_forward, kernel_size=k,
                                    padding=p, dilation=d, strides=s))
    out = jax.block_until_ready(fwd(x, prep))

    ref = residual_reference(x, params, kernel_size=k, padding=p, dilation=d,
                             strides=s)
    ref = jax.block_until_ready(ref)

    assert out.shape == ref.shape == (B, C_out, H, W)
    np.testing.assert_allclose(np.asarray(out), np.asarray(ref),
                               atol=2e-2, rtol=2e-2)
    print("KERNEL_OK")
</pallas_src>

<mosaic_0001>
module attributes {stable_mosaic.version = 11 : i64} {
  func.func @_residual_kernel(%arg0: i32, %arg1: memref<1x16x64xf32, #tpu.memory_space<vmem>>, %arg2: memref<320x256xbf16, #tpu.memory_space<vmem>>, %arg3: memref<640x128xbf16, #tpu.memory_space<vmem>>, %arg4: memref<1x128xf32, #tpu.memory_space<vmem>>, %arg5: memref<1x128xf32, #tpu.memory_space<vmem>>, %arg6: memref<1x16x128xf32, #tpu.memory_space<vmem>>, %arg7: memref<16x320xf32, #tpu.memory_space<vmem>>, %arg8: memref<16x640xf32, #tpu.memory_space<vmem>>) attributes {dimension_semantics = [#tpu.dimension_semantics<parallel>], iteration_bounds = array<i64: 2>, scalar_prefetch = 0 : i64, scratch_operands = 2 : i64, tpu.core_type = #tpu.core_type<tc>, window_params = [{transform_indices = @transform_0, window_bounds = array<i64: 1, 16, 64>}, {pipeline_mode = #tpu.pipeline_mode<synchronous>, transform_indices = @transform_1, window_bounds = array<i64: 320, 256>}, {pipeline_mode = #tpu.pipeline_mode<synchronous>, transform_indices = @transform_2, window_bounds = array<i64: 640, 128>}, {pipeline_mode = #tpu.pipeline_mode<synchronous>, transform_indices = @transform_3, window_bounds = array<i64: 1, 128>}, {pipeline_mode = #tpu.pipeline_mode<synchronous>, transform_indices = @transform_4, window_bounds = array<i64: 1, 128>}, {transform_indices = @transform_5, window_bounds = array<i64: 1, 16, 128>}]} {
    %cst = arith.constant 0.000000e+00 : f32
    %0 = vector.broadcast %cst : f32 to vector<4x64xf32>
    %c0 = arith.constant 0 : index
    %c0_0 = arith.constant 0 : index
    %1 = vector.load %arg7[%c0, %c0_0] : memref<16x320xf32, #tpu.memory_space<vmem>>, vector<4x64xf32>
    tpu.vector_store %arg7[%c0, %c0_0], %0 {strides = array<i32>} : memref<16x320xf32, #tpu.memory_space<vmem>>, vector<4x64xf32>,
    %c0_1 = arith.constant 0 : index
    %c0_2 = arith.constant 0 : index
    %c0_3 = arith.constant 0 : index
    %2 = vector.load %arg1[%c0_1, %c0_2, %c0_3] : memref<1x16x64xf32, #tpu.memory_space<vmem>>, vector<1x12x64xf32>
    %3 = vector.shape_cast %2 : vector<1x12x64xf32> to vector<12x64xf32>
    %c4 = arith.constant 4 : index
    %c0_4 = arith.constant 0 : index
    %4 = vector.load %arg7[%c4, %c0_4] : memref<16x320xf32, #tpu.memory_space<vmem>>, vector<12x64xf32>
    tpu.vector_store %arg7[%c4, %c0_4], %3 {strides = array<i32>} : memref<16x320xf32, #tpu.memory_space<vmem>>, vector<12x64xf32>,
    %cst_5 = arith.constant 0.000000e+00 : f32
    %5 = vector.broadcast %cst_5 : f32 to vector<2x64xf32>
    %c0_6 = arith.constant 0 : index
    %c64 = arith.constant 64 : index
    %6 = vector.load %arg7[%c0_6, %c64] : memref<16x320xf32, #tpu.memory_space<vmem>>, vector<2x64xf32>
    tpu.vector_store %arg7[%c0_6, %c64], %5 {strides = array<i32>} : memref<16x320xf32, #tpu.memory_space<vmem>>, vector<2x64xf32>,
    %c0_7 = arith.constant 0 : index
    %c0_8 = arith.constant 0 : index
    %c0_9 = arith.constant 0 : index
    %7 = vector.load %arg1[%c0_7, %c0_8, %c0_9] : memref<1x16x64xf32, #tpu.memory_space<vmem>>, vector<1x14x64xf32>
    %8 = vector.shape_cast %7 : vector<1x14x64xf32> to vector<14x64xf32>
    %c2 = arith.constant 2 : index
    %c64_10 = arith.constant 64 : index
    %9 = vector.load %arg7[%c2, %c64_10] : memref<16x320xf32, #tpu.memory_space<vmem>>, vector<14x64xf32>
    tpu.vector_store %arg7[%c2, %c64_10], %8 {strides = array<i32>} : memref<16x320xf32, #tpu.memory_space<vmem>>, vector<14x64xf32>,
    %c0_11 = arith.constant 0 : index
    %c0_12 = arith.constant 0 : index
    %c0_13 = arith.constant 0 : index
    %10 = vector.load %arg1[%c0_11, %c0_12, %c0_13] : memref<1x16x64xf32, #tpu.memory_space<vmem>>, vector<1x16x64xf32>
    %11 = vector.shape_cast %10 : vector<1x16x64xf32> to vector<16x64xf32>
    %c0_14 = arith.constant 0 : index
    %c128 = arith.constant 128 : index
    %12 = vector.load %arg7[%c0_14, %c128] : memref<16x320xf32, #tpu.memory_space<vmem>>, vector<16x64xf32>
    tpu.vector_store %arg7[%c0_14, %c128], %11 {strides = array<i32>} : memref<16x320xf32, #tpu.memory_space<vmem>>, vector<16x64xf32>,
    %cst_15 = arith.constant 0.000000e+00 : f32
    %13 = vector.broadcast %cst_15 : f32 to vector<2x64xf32>
    %c14 = arith.constant 14 : index
    %c192 = arith.constant 192 : index
    %14 = vector.load %arg7[%c14, %c192] : memref<16x320xf32, #tpu.memory_space<vmem>>, vector<2x64xf32>
    tpu.vector_store %arg7[%c14, %c192], %13 {strides = array<i32>} : memref<16x320xf32, #tpu.memory_space<vmem>>, vector<2x64xf32>,
    %c0_16 = arith.constant 0 : index
    %c2_17 = arith.constant 2 : index
    %c0_18 = arith.constant 0 : index
    %15 = vector.load %arg1[%c0_16, %c2_17, %c0_18] : memref<1x16x64xf32, #tpu.memory_space<vmem>>, vector<1x14x64xf32>
    %16 = vector.shape_cast %15 : vector<1x14x64xf32> to vector<14x64xf32>
    %c0_19 = arith.constant 0 : index
    %c192_20 = arith.constant 192 : index
    %17 = vector.load %arg7[%c0_19, %c192_20] : memref<16x320xf32, #tpu.memory_space<vmem>>, vector<14x64xf32>
    tpu.vector_store %arg7[%c0_19, %c192_20], %16 {strides = array<i32>} : memref<16x320xf32, #tpu.memory_space<vmem>>, vector<14x64xf32>,
    %cst_21 = arith.constant 0.000000e+00 : f32
    %18 = vector.broadcast %cst_21 : f32 to vector<4x64xf32>
    %c12 = arith.constant 12 : index
    %c256 = arith.constant 256 : index
    %19 = vector.load %arg7[%c12, %c256] : memref<16x320xf32, #tpu.memory_space<vmem>>, vector<4x64xf32>
    tpu.vector_store %arg7[%c12, %c256], %18 {strides = array<i32>} : memref<16x320xf32, #tpu.memory_space<vmem>>, vector<4x64xf32>,
    %c0_22 = arith.constant 0 : index
    %c4_23 = arith.constant 4 : index
    %c0_24 = arith.constant 0 : index
    %20 = vector.load %arg1[%c0_22, %c4_23, %c0_24] : memref<1x16x64xf32, #tpu.memory_space<vmem>>, vector<1x12x64xf32>
    %21 = vector.shape_cast %20 : vector<1x12x64xf32> to vector<12x64xf32>
    %c0_25 = arith.constant 0 : index
    %c256_26 = arith.constant 256 : index
    %22 = vector.load %arg7[%c0_25, %c256_26] : memref<16x320xf32, #tpu.memory_space<vmem>>, vector<12x64xf32>
    tpu.vector_store %arg7[%c0_25, %c256_26], %21 {strides = array<i32>} : memref<16x320xf32, #tpu.memory_space<vmem>>, vector<12x64xf32>,
    %c0_27 = arith.constant 0 : index
    %c0_28 = arith.constant 0 : index
    %23 = vector.load %arg7[%c0_27, %c0_28] : memref<16x320xf32, #tpu.memory_space<vmem>>, vector<16x320xf32>
    %24 = arith.truncf %23 : vector<16x320xf32> to vector<16x320xbf16>
    %c0_29 = arith.constant 0 : index
    %c0_30 = arith.constant 0 : index
    %25 = vector.load %arg2[%c0_29, %c0_30] : memref<320x256xbf16, #tpu.memory_space<vmem>>, vector<320x256xbf16>
    %cst_31 = arith.constant dense<0.000000e+00> : vector<16x256xf32>
    %26 = tpu.matmul %24, %25, %cst_31 {dimension_numbers = #tpu.dot_dimension_numbers<[1], [0], [0], [1], [0, 0, 1, 1], [], []>} : vector<16x320xbf16>, vector<320x256xbf16>, vector<16x256xf32> -> vector<16x256xf32>
    %27 = vector.extract_strided_slice %26 {offsets = [0, 0], sizes = [16, 128], strides = [1, 1]} : vector<16x256xf32> to vector<16x128xf32>
    %c0_32 = arith.constant 0 : index
    %c0_33 = arith.constant 0 : index
    %28 = vector.load %arg4[%c0_32, %c0_33] : memref<1x128xf32, #tpu.memory_space<vmem>>, vector<1x128xf32>
    %29 = vector.broadcast %28 : vector<1x128xf32> to vector<16x128xf32>
    %30 = arith.addf %27, %29 : vector<16x128xf32>
    %cst_34 = arith.constant 0.000000e+00 : f32
    %31 = vector.broadcast %cst_34 : f32 to vector<16x128xf32>
    %32 = arith.maximumf %30, %31 : vector<16x128xf32>
    %33 = vector.extract_strided_slice %26 {offsets = [0, 128], sizes = [16, 128], strides = [1, 1]} : vector<16x256xf32> to vector<16x128xf32>
    %cst_35 = arith.constant 0.000000e+00 : f32
    %34 = vector.broadcast %cst_35 : f32 to vector<8x128xf32>
    %c0_36 = arith.constant 0 : index
    %c0_37 = arith.constant 0 : index
    %35 = vector.load %arg8[%c0_36, %c0_37] : memref<16x640xf32, #tpu.memory_space<vmem>>, vector<8x128xf32>
    tpu.vector_store %arg8[%c0_36, %c0_37], %34 {strides = array<i32>} : memref<16x640xf32, #tpu.memory_space<vmem>>, vector<8x128xf32>,
    %36 = vector.extract_strided_slice %32 {offsets = [0, 0], sizes = [8, 128], strides = [1, 1]} : vector<16x128xf32> to vector<8x128xf32>
    %c8 = arith.constant 8 : index
    %c0_38 = arith.constant 0 : index
    %37 = vector.load %arg8[%c8, %c0_38] : memref<16x640xf32, #tpu.memory_space<vmem>>, vector<8x128xf32>
    tpu.vector_store %arg8[%c8, %c0_38], %36 {strides = array<i32>} : memref<16x640xf32, #tpu.memory_space<vmem>>, vector<8x128xf32>,
    %cst_39 = arith.constant 0.000000e+00 : f32
    %38 = vector.broadcast %cst_39 : f32 to vector<4x128xf32>
    %c0_40 = arith.constant 0 : index
    %c128_41 = arith.constant 128 : index
    %39 = vector.load %arg8[%c0_40, %c128_41] : memref<16x640xf32, #tpu.memory_space<vmem>>, vector<4x128xf32>
    tpu.vector_store %arg8[%c0_40, %c128_41], %38 {strides = array<i32>} : memref<16x640xf32, #tpu.memory_space<vmem>>, vector<4x128xf32>,
    %40 = vector.extract_strided_slice %32 {offsets = [0, 0], sizes = [12, 128], strides = [1, 1]} : vector<16x128xf32> to vector<12x128xf32>
    %c4_42 = arith.constant 4 : index
    %c128_43 = arith.constant 128 : index
    %41 = vector.load %arg8[%c4_42, %c128_43] : memref<16x640xf32, #tpu.memory_space<vmem>>, vector<12x128xf32>
    tpu.vector_store %arg8[%c4_42, %c128_43], %40 {strides = array<i32>} : memref<16x640xf32, #tpu.memory_space<vmem>>, vector<12x128xf32>,
    %c0_44 = arith.constant 0 : index
    %c256_45 = arith.constant 256 : index
    %42 = vector.load %arg8[%c0_44, %c256_45] : memref<16x640xf32, #tpu.memory_space<vmem>>, vector<16x128xf32>
    tpu.vector_store %arg8[%c0_44, %c256_45], %32 {strides = array<i32>} : memref<16x640xf32, #tpu.memory_space<vmem>>, vector<16x128xf32>,
    %cst_46 = arith.constant 0.000000e+00 : f32
    %43 = vector.broadcast %cst_46 : f32 to vector<4x128xf32>
    %c12_47 = arith.constant 12 : index
    %c384 = arith.constant 384 : index
    %44 = vector.load %arg8[%c12_47, %c384] : memref<16x640xf32, #tpu.memory_space<vmem>>, vector<4x128xf32>
    tpu.vector_store %arg8[%c12_47, %c384], %43 {strides = array<i32>} : memref<16x640xf32, #tpu.memory_space<vmem>>, vector<4x128xf32>,
    %45 = vector.extract_strided_slice %32 {offsets = [4, 0], sizes = [12, 128], strides = [1, 1]} : vector<16x128xf32> to vector<12x128xf32>
    %c0_48 = arith.constant 0 : index
    %c384_49 = arith.constant 384 : index
    %46 = vector.load %arg8[%c0_48, %c384_49] : memref<16x640xf32, #tpu.memory_space<vmem>>, vector<12x128xf32>
    tpu.vector_store %arg8[%c0_48, %c384_49], %45 {strides = array<i32>} : memref<16x640xf32, #tpu.memory_space<vmem>>, vector<12x128xf32>,
    %cst_50 = arith.constant 0.000000e+00 : f32
    %47 = vector.broadcast %cst_50 : f32 to vector<8x128xf32>
    %c8_51 = arith.constant 8 : index
    %c512 = arith.constant 512 : index
    %48 = vector.load %arg8[%c8_51, %c512] : memref<16x640xf32, #tpu.memory_space<vmem>>, vector<8x128xf32>
    tpu.vector_store %arg8[%c8_51, %c512], %47 {strides = array<i32>} : memref<16x640xf32, #tpu.memory_space<vmem>>, vector<8x128xf32>,
    %49 = vector.extract_strided_slice %32 {offsets = [8, 0], sizes = [8, 128], strides = [1, 1]} : vector<16x128xf32> to vector<8x128xf32>
    %c0_52 = arith.constant 0 : index
    %c512_53 = arith.constant 512 : index
    %50 = vector.load %arg8[%c0_52, %c512_53] : memref<16x640xf32, #tpu.memory_space<vmem>>, vector<8x128xf32>
    tpu.vector_store %arg8[%c0_52, %c512_53], %49 {strides = array<i32>} : memref<16x640xf32, #tpu.memory_space<vmem>>, vector<8x128xf32>,
    %c0_54 = arith.constant 0 : index
    %c0_55 = arith.constant 0 : index
    %51 = vector.load %arg8[%c0_54, %c0_55] : memref<16x640xf32, #tpu.memory_space<vmem>>, vector<16x640xf32>
    %52 = arith.truncf %51 : vector<16x640xf32> to vector<16x640xbf16>
    %c0_56 = arith.constant 0 : index
    %c0_57 = arith.constant 0 : index
    %53 = vector.load %arg3[%c0_56, %c0_57] : memref<640x128xbf16, #tpu.memory_space<vmem>>, vector<640x128xbf16>
    %cst_58 = arith.constant dense<0.000000e+00> : vector<16x128xf32>
    %54 = tpu.matmul %52, %53, %cst_58 {dimension_numbers = #tpu.dot_dimension_numbers<[1], [0], [0], [1], [0, 0, 1, 1], [], []>} : vector<16x640xbf16>, vector<640x128xbf16>, vector<16x128xf32> -> vector<16x128xf32>
    %55 = arith.addf %54, %33 : vector<16x128xf32>
    %c0_59 = arith.constant 0 : index
    %c0_60 = arith.constant 0 : index
    %56 = vector.load %arg5[%c0_59, %c0_60] : memref<1x128xf32, #tpu.memory_space<vmem>>, vector<1x128xf32>
    %57 = vector.broadcast %56 : vector<1x128xf32> to vector<16x128xf32>
    %58 = arith.addf %55, %57 : vector<16x128xf32>
    %cst_61 = arith.constant 0.000000e+00 : f32
    %59 = vector.broadcast %cst_61 : f32 to vector<16x128xf32>
    %60 = arith.maximumf %58, %59 : vector<16x128xf32>
    %c0_62 = arith.constant 0 : index
    %c0_63 = arith.constant 0 : index
    %c0_64 = arith.constant 0 : index
    %61 = vector.load %arg6[%c0_62, %c0_63, %c0_64] : memref<1x16x128xf32, #tpu.memory_space<vmem>>, vector<1x16x128xf32>
    %62 = vector.shape_cast %61 : vector<1x16x128xf32> to vector<16x128xf32>
    %63 = vector.shape_cast %60 : vector<16x128xf32> to vector<1x16x128xf32>
    tpu.vector_store %arg6[%c0_62, %c0_63, %c0_64], %63 {strides = array<i32>} : memref<1x16x128xf32, #tpu.memory_space<vmem>>, vector<1x16x128xf32>,
    return
  }
  func.func @transform_0(%arg0: i32) -> (i32, i32, i32) {
    %c0_i32 = arith.constant 0 : i32
    %c0_i32_0 = arith.constant 0 : i32
    %c0_i32_1 = arith.constant 0 : i32
    return %arg0, %c0_i32, %c0_i32_0 : i32, i32, i32
  }
  func.func @transform_1(%arg0: i32) -> (i32, i32) {
    %c0_i32 = arith.constant 0 : i32
    %c0_i32_0 = arith.constant 0 : i32
    %c0_i32_1 = arith.constant 0 : i32
    return %c0_i32, %c0_i32_0 : i32, i32
  }
  func.func @transform_2(%arg0: i32) -> (i32, i32) {
    %c0_i32 = arith.constant 0 : i32
    %c0_i32_0 = arith.constant 0 : i32
    %c0_i32_1 = arith.constant 0 : i32
    return %c0_i32, %c0_i32_0 : i32, i32
  }
  func.func @transform_3(%arg0: i32) -> (i32, i32) {
    %c0_i32 = arith.constant 0 : i32
    %c0_i32_0 = arith.constant 0 : i32
    %c0_i32_1 = arith.constant 0 : i32
    return %c0_i32, %c0_i32_0 : i32, i32
  }
  func.func @transform_4(%arg0: i32) -> (i32, i32) {
    %c0_i32 = arith.constant 0 : i32
    %c0_i32_0 = arith.constant 0 : i32
    %c0_i32_1 = arith.constant 0 : i32
    return %c0_i32, %c0_i32_0 : i32, i32
  }
  func.func @transform_5(%arg0: i32) -> (i32, i32, i32) {
    %c0_i32 = arith.constant 0 : i32
    %c0_i32_0 = arith.constant 0 : i32
    %c0_i32_1 = arith.constant 0 : i32
    return %arg0, %c0_i32, %c0_i32_0 : i32, i32, i32
  }
}

</mosaic_0001>

<bundles_post_ra>
// kernel: residual_forward.1
= control target key start
LH: loop header
LB: loop body
LE: loop exit
PB: predicated region body
PF: predicated region fallthrough
CT: control target
= control target key end

     0   :  { %10 = vsyncpa [#allocation5], 0  ;;  %s1668_s18 = smov 0   ;;  %s1984_s0 = inlined_call_operand.vmem [shape: f32[2,16,64], index: 0, kind: input, shape index: {}]   ;;  %s1985_s1 = inlined_call_operand.vmem [shape: bf16[320,256], index: 1, kind: input, shape index: {}]   ;;  %s1986_s2 = inlined_call_operand.hbm [shape: bf16[640,128], index: 2, kind: input, shape index: {}]   ;;  %s1987_s3 = inlined_call_operand.vmem [shape: f32[1,128], index: 3, kind: input, shape index: {}]   ;;  %s1988_s4 = inlined_call_operand.vmem [shape: f32[1,128], index: 4, kind: input, shape index: {}]   ;;  %s1989_s5 = inlined_call_operand.vmem [shape: f32[2,16,128], index: 5, kind: output, shape index: {}]  }
   0x1 LB: > { %s171_s21 = sshll.u32 %s1986_s2, 4  ;;  %s1149_s22 = sadd.s32 4294967295, %s1631_s18   ;;  %s1631_s18 = sphi %s1668_s18, %s16_s18   ;;  %s172_s21 = int_to_ptr.hbm [resolvable:$true] %s171_s21 }
   0x2   : > { %p1151_p0 = scmp.ge.s32.totalorder %s1631_s18, 1  ;;  %p157_p1 = scmp.lt.s32.totalorder %s1631_s18, 3 }
   0x3   : > { %p1574_p2 = scmp.eq.s32.totalorder %s1149_s22, 0  ;;  %s1633_s23 = smov [#allocation4]  }
   0x4   : > { %p158_p3 = pnand %p1151_p0, %p157_p1  ;;  %s173_s24 = sshll.u32 %s1633_s23, 4  ;;  %s174_s24 = int_to_ptr.vmem [resolvable:$true] %s173_s24 }
   0x5   : > { %s1634_s25 = smov 64   ;;  %s1635_s26 = smov 4  }
   0x6   : > { %p1570_p4 = pneg %p158_p3  ;;  %203 = sbr.rel (%p158_p3) target bundleno = 457 (0x1c9), region = 40 }
   0x8   : > { %p1571_p5 = pnand %p1574_p2, %p1570_p4 }
   0xa   : > { %1573 = dma.hbm_to_vmem [thread:$0]  (!%p1571_p5), %s172_s21, 5120, %s174_s24, [#allocation5], %s1634_s25, %s1634_s25, %s1635_s26  }
   0xb   : > { %1626 = dma.done.wait (%p1574_p2), [#allocation5], 5120  }
   0xc   : > { %1628 = vsyncadd (%p1574_p2), [#allocation5], 4294962176  ;;  %p232_p6 = scmp.lt.s32.totalorder %s1149_s22, 1  ;;  %vm257_vm0 = vcmask 523264   ;;  %s1636_s6 = smov 64   ;;  %vm265_vm1 = vcmask 1041408  }
   0xd   : > { %v1314_v4 = vld [vmem:[%s1985_s1 + $0x130] sm:$0xf]  ;;  %v1525_v6 = vld [vmem:[%s1985_s1 + $0x134] sm:$0xf0]  ;;  %v1306_v7 = vld [vmem:[%s1985_s1 + $0x120] sm:$0xf] }
   0xe   : > { %s1991_s22 = smov (!%p232_p6, %s1149_s22), 1  ;;  %v1315_v8 = vor.u32 %v1525_v6, %v1314_v4  ;;  %v1523_v9 = vld [vmem:[%s1985_s1 + $0x124] sm:$0xf0]  ;;  %v1282_v12 = vld [vmem:[%s1985_s1 + $0xf0] sm:$0xf]  ;;  %vm243_vm2 = vcmask 519168  }
   0xf   : > { %s1484_s27 = sshll.u32 %s1991_s22, 4  ;;  %v1307_v13 = vor.u32 %v1523_v9, %v1306_v7  ;;  %v1298_v14 = vld [vmem:[%s1985_s1 + $0x110] sm:$0xf]  ;;  %v1521_v15 = vld [vmem:[%s1985_s1 + $0x114] sm:$0xf0]  ;;  %vm255_vm3 = vcmask 523268  }
  0x10   : > { %s1687_s30 = scalar_lea.vmem %s1984_s0, %s1484_s27  ;;  %587 = vmatpush.bf16.msra.mxu2 %v1315_v8  ;;  %v1517_v16 = vld [vmem:[%s1985_s1 + $0xf4] sm:$0xf0]  ;;  %v1218_v18 = vld [vmem:[%s1985_s1 + $0x70] sm:$0xf]  ;;  %v1500_v20 = vld [vmem:[%s1985_s1 + $0x74] sm:$0xf]  ;;  %v1299_v31 = vor.u32 %v1521_v15, %v1298_v14  ;;  %s241_s26 = scalar_lea.vmem %s1989_s5, %s1484_s27 }
  0x11   : > { %v285_v0 = vld [vmem:[%s1687_s30 + $0x2] sm:$0xff]  ;;  %v286_v10 = vld [vmem:[%s1687_s30 + $0xa] sm:$0x3f]  ;;  %v1283_v17 = vor.u32 %v1517_v16, %v1282_v12  ;;  %v1501_v19 = vld [vmem:[%s1985_s1 + $0x74] sm:$0xf0]  ;;  %v1637_v63 = vmov 0.0  }
  0x12   : > { %v1691_v1 = vld [vmem:[%s1687_s30] sm:$0xff]  ;;  %289 = vrot.lane.b32.xlu1 %v285_v0, %s1636_s6  ;;  %v262_v3 = vld [vmem:[%s1687_s30 + $0x8] sm:$0x3f]  ;;  %v1219_v21 = vor.u32 %v1501_v19, %v1218_v18  ;;  %v1220_v22 = vld [vmem:[%s1985_s1 + $0x78] sm:$0xf0]  ;;  %vm259_vm4 = vcmask 1041920  }
  0x13   : > { %v266_v2 = vrot.slane %v1691_v1, 6  ;;  %v299_v5 = vld [vmem:[%s1687_s30 + $0x4] sm:$0xff]  ;;  %v267_v11 = vrot.slane %v262_v3, 6  ;;  %v1274_v23 = vld [vmem:[%s1985_s1 + $0xe0] sm:$0xf]  ;;  %569 = vmatpush.bf16.msra.mxu1 %v1283_v17  ;;  %v1223_v28 = vor.u32 %v1500_v20, %v1220_v22  ;;  %281 = vst.msk [vmem:[#allocation2 + $0x8] sm:$0xff] %vm257_vm0, %v1691_v1 }
  0x14   : > { %301 = vst.msk [vmem:[#allocation2 + $0x10] sm:$0xff] %vm257_vm0, %v299_v5  ;;  %v1515_v24 = vld [vmem:[%s1985_s1 + $0xe4] sm:$0xf0]  ;;  %v1290_v26 = vld [vmem:[%s1985_s1 + $0x100] sm:$0xf]  ;;  %588 = vmatpush.bf16.msra.mxu2 %v1307_v13  ;;  %555 = vmatpush.bf16.msra.mxu0 %v1219_v21  ;;  %v250_v6 = vrot.slane %v1691_v1, 4 }
  0x15   : > { %269 = vrot.lane.b32.xlu0 %v266_v2, %s1636_s6  ;;  %v268_v25 = vsel %vm265_vm1, %v266_v2, %v267_v11  ;;  %v1519_v27 = vld [vmem:[%s1985_s1 + $0x104] sm:$0xf0]  ;;  %v1275_v29 = vor.u32 %v1515_v24, %v1274_v23  ;;  %v1210_v30 = vld [vmem:[%s1985_s1 + $0x60] sm:$0xf]  ;;  %v1498_v33 = vld [vmem:[%s1985_s1 + $0x64] sm:$0xf]  ;;  %597 = vmatpush.bf16.msra.mxu3 %v1223_v28 }
  0x16   : > { %v1499_v32 = vld [vmem:[%s1985_s1 + $0x64] sm:$0xf0]  ;;  %v1212_v34 = vld [vmem:[%s1985_s1 + $0x68] sm:$0xf0]  ;;  %v1516_v35 = vld [vmem:[%s1985_s1 + $0xf4] sm:$0xf]  ;;  %v1291_v46 = vor.u32 %v1519_v27, %v1290_v26 }
  0x17   : > { %v1211_v36 = vor.u32 %v1499_v32, %v1210_v30  ;;  %v1215_v37 = vor.u32 %v1498_v33, %v1212_v34  ;;  %v1266_v38 = vld [vmem:[%s1985_s1 + $0xd0] sm:$0xf]  ;;  %v1513_v39 = vld [vmem:[%s1985_s1 + $0xd4] sm:$0xf0]  ;;  %v1284_v40 = vld [vmem:[%s1985_s1 + $0xf8] sm:$0xf0]  ;;  %570 = vmatpush.bf16.msra.mxu1 %v1275_v29 }
  0x18   : > { %v1202_v41 = vld [vmem:[%s1985_s1 + $0x50] sm:$0xf]  ;;  %v1497_v42 = vld [vmem:[%s1985_s1 + $0x54] sm:$0xf0]  ;;  %v1267_v43 = vor.u32 %v1513_v39, %v1266_v38  ;;  %v1496_v44 = vld [vmem:[%s1985_s1 + $0x54] sm:$0xf]  ;;  %589 = vmatpush.bf16.msra.mxu2 %v1299_v31  ;;  %v1287_v49 = vor.u32 %v1516_v35, %v1284_v40 }
  0x19   : > { %v1204_v45 = vld [vmem:[%s1985_s1 + $0x58] sm:$0xf0]  ;;  %v1258_v47 = vld [vmem:[%s1985_s1 + $0xc0] sm:$0xf]  ;;  %v1511_v48 = vld [vmem:[%s1985_s1 + $0xc4] sm:$0xf0]  ;;  %556 = vmatpush.bf16.msra.mxu0 %v1211_v36  ;;  %598 = vmatpush.bf16.msra.mxu3 %v1215_v37  ;;  %v1203_v50 = vor.u32 %v1497_v42, %v1202_v41 }
  0x1a   : > { %291 = vrot.lane.b32.xlu1 %v286_v10, %s1636_s6  ;;  %v1514_v51 = vld [vmem:[%s1985_s1 + $0xe4] sm:$0xf]  ;;  %v1276_v52 = vld [vmem:[%s1985_s1 + $0xe8] sm:$0xf0]  ;;  %v1207_v53 = vor.u32 %v1496_v44, %v1204_v45  ;;  %v1259_v54 = vor.u32 %v1511_v48, %v1258_v47  ;;  %v1512_v56 = vld [vmem:[%s1985_s1 + $0xd4] sm:$0xf] }
  0x1b   : > { %571 = vmatpush.bf16.msra.mxu1 %v1267_v43  ;;  %v1279_v55 = vor.u32 %v1514_v51, %v1276_v52  ;;  %v1268_v57 = vld [vmem:[%s1985_s1 + $0xd8] sm:$0xf0]  ;;  %v1510_v59 = vld [vmem:[%s1985_s1 + $0xc4] sm:$0xf]  ;;  %v1260_v60 = vld [vmem:[%s1985_s1 + $0xc8] sm:$0xf0] }
  0x1c   : > { %590 = vmatpush.bf16.msra.mxu2 %v1291_v46  ;;  %v1271_v58 = vor.u32 %v1512_v56, %v1268_v57  ;;  %v1263_v61 = vor.u32 %v1510_v59, %v1260_v60  ;;  %v300_v62 = vld [vmem:[%s1687_s30 + $0xc] sm:$0xf]  ;;  %298 = vst.msk [vmem:[#allocation2 + $0x28] sm:$0xf0] %vm255_vm3, %v1637_v63  ;;  %v1194_v0 = vld [vmem:[%s1985_s1 + $0x40] sm:$0xf] }
  0x1d   : > { %271 = vrot.lane.b32.xlu0 %v268_v25, %s1636_s6  ;;  %557 = vmatpush.bf16.msra.mxu0 %v1203_v50  ;;  %302 = vst.msk [vmem:[#allocation2 + $0x28] sm:$0xf] %vm243_vm2, %v300_v62  ;;  %v1495_v2 = vld [vmem:[%s1985_s1 + $0x44] sm:$0xf0]  ;;  %v1494_v3 = vld [vmem:[%s1985_s1 + $0x44] sm:$0xf] }
  0x1e   : > { %599 = vmatpush.bf16.msra.mxu3 %v1207_v53  ;;  %244 = vst.msk [vmem:[#allocation2] sm:$0xf] %vm243_vm2, %v1637_v63  ;;  %v1195_v4 = vor.u32 %v1495_v2, %v1194_v0  ;;  %v1196_v5 = vld [vmem:[%s1985_s1 + $0x48] sm:$0xf0]  ;;  %v305_v7 = vld [vmem:[#allocation2 + $0x10] sm:$0xff]  ;;  %vm283_vm5 = vcmask 1048070  }
  0x1f   : > { %572 = vmatpush.bf16.msra.mxu1 %v1259_v54  ;;  %649 = vst [vmem:[#allocation3 + $0x30] sm:$0xf] %v1637_v63  ;;  %v1199_v8 = vor.u32 %v1494_v3, %v1196_v5  ;;  %v1250_v10 = vld [vmem:[%s1985_s1 + $0xb0] sm:$0xf]  ;;  %v1509_v12 = vld [vmem:[%s1985_s1 + $0xb4] sm:$0xf0] }
  0x20   : > { %611 = vmatpush.bf16.msrb.mxu2 %v1287_v49  ;;  %661 = vst [vmem:[#allocation3 + $0x28] sm:$0xf0] %v1637_v63  ;;  %v1508_v1 = vld [vmem:[%s1985_s1 + $0xb4] sm:$0xf]  ;;  %v1251_v13 = vor.u32 %v1509_v12, %v1250_v10  ;;  %v1252_v14 = vld [vmem:[%s1985_s1 + $0xb8] sm:$0xf0] }
  0x21   : > { %558 = vmatpush.bf16.msra.mxu0 %v1195_v4  ;;  %256 = vst.msk [vmem:[#allocation2] sm:$0xf0] %vm255_vm3, %v250_v6  ;;  %v1186_v15 = vld [vmem:[%s1985_s1 + $0x30] sm:$0xf]  ;;  %v1255_v16 = vor.u32 %v1508_v1, %v1252_v14  ;;  %v1493_v17 = vld [vmem:[%s1985_s1 + $0x34] sm:$0xf0] }
  0x22   : > { %600 = vmatpush.bf16.msra.mxu3 %v1199_v8  ;;  %260 = vst.msk [vmem:[#allocation2] sm:$0x3] %vm259_vm4, %v1637_v63  ;;  %v1492_v18 = vld [vmem:[%s1985_s1 + $0x34] sm:$0xf]  ;;  %v1188_v19 = vld [vmem:[%s1985_s1 + $0x38] sm:$0xf0]  ;;  %v1187_v20 = vor.u32 %v1493_v17, %v1186_v15 }
  0x23   : > { %573 = vmatpush.bf16.msra.mxu1 %v1251_v13  ;;  %v1191_v21 = vor.u32 %v1492_v18, %v1188_v19  ;;  %v1242_v22 = vld [vmem:[%s1985_s1 + $0xa0] sm:$0xf]  ;;  %v1507_v23 = vld [vmem:[%s1985_s1 + $0xa4] sm:$0xf0]  ;;  %v1506_v24 = vld [vmem:[%s1985_s1 + $0xa4] sm:$0xf] }
  0x24   : > { %612 = vmatpush.bf16.msrb.mxu2 %v1279_v55  ;;  %v308_v9 = vld [vmem:[#allocation2 + $0x28] sm:$0xff]  ;;  %v1243_v25 = vor.u32 %v1507_v23, %v1242_v22  ;;  %v1178_v30 = vld [vmem:[%s1985_s1 + $0x20] sm:$0xf]  ;;  %v1490_v34 = vld [vmem:[%s1985_s1 + $0x24] sm:$0xf]  ;;  %vm249_vm6 = vcmask 1043456  }
  0x25   : > { %v1836_v11 = vpack.c.bf16 %v308_v9, %v305_v7  ;;  %v1244_v26 = vld [vmem:[%s1985_s1 + $0xa8] sm:$0xf0]  ;;  %v246_v27 = vld [vmem:[%s1687_s30 + $0x8] sm:$0xf]  ;;  %559 = vmatpush.bf16.msra.mxu0 %v1187_v20  ;;  %v1234_v38 = vld [vmem:[%s1985_s1 + $0x90] sm:$0xf] }
  0x26   : > { %601 = vmatpush.bf16.msra.mxu3 %v1191_v21  ;;  %v1247_v28 = vor.u32 %v1506_v24, %v1244_v26  ;;  %v280_v29 = vld [vmem:[%s1687_s30 + $0x8] sm:$0xff]  ;;  %v251_v32 = vrot.slane %v246_v27, 4  ;;  %v1505_v39 = vld [vmem:[%s1985_s1 + $0x94] sm:$0xf0]  ;;  %v1504_v41 = vld [vmem:[%s1985_s1 + $0x94] sm:$0xf] }
  0x27   : > { %1320 = vmatmul.msk.bf16.vlgmr.msra.gmra.mxu2 %vm257_vm0, %v1836_v11  ;;  %v1491_v31 = vld [vmem:[%s1985_s1 + $0x24] sm:$0xf0]  ;;  %282 = vst.msk [vmem:[#allocation2 + $0x20] sm:$0xff] %vm257_vm0, %v280_v29  ;;  %v1180_v35 = vld [vmem:[%s1985_s1 + $0x28] sm:$0xf0]  ;;  %574 = vmatpush.bf16.msra.mxu1 %v1243_v25  ;;  %v1235_v40 = vor.u32 %v1505_v39, %v1234_v38  ;;  %vm277_vm7 = vcmask 1048064  }
  0x28   : > { %613 = vmatpush.bf16.msrb.mxu2 %v1271_v58  ;;  %v1179_v33 = vor.u32 %v1491_v31, %v1178_v30  ;;  %284 = vst.msk [vmem:[#allocation2 + $0x20] sm:$0xc0] %vm283_vm5, %v1637_v63  ;;  %v1183_v36 = vor.u32 %v1490_v34, %v1180_v35  ;;  %v252_v37 = vsel %vm249_vm6, %v250_v6, %v251_v32  ;;  %v1236_v42 = vld [vmem:[%s1985_s1 + $0x98] sm:$0xf0]  ;;  %v1170_v44 = vld [vmem:[%s1985_s1 + $0x10] sm:$0xf] }
  0x29   : > { %258 = vst.msk [vmem:[#allocation2 + $0x18] sm:$0xff] %vm257_vm0, %v252_v37  ;;  %v1239_v43 = vor.u32 %v1504_v41, %v1236_v42  ;;  %v1489_v45 = vld [vmem:[%s1985_s1 + $0x14] sm:$0xf0]  ;;  %v1488_v46 = vld [vmem:[%s1985_s1 + $0x14] sm:$0xf]  ;;  %vm275_vm8 = vcmask 1048066  }
  0x2a   : > { %560 = vmatpush.bf16.msra.mxu0 %v1179_v33  ;;  %602 = vmatpush.bf16.msra.mxu3 %v1183_v36  ;;  %v1171_v47 = vor.u32 %v1489_v45, %v1170_v44  ;;  %v1172_v48 = vld [vmem:[%s1985_s1 + $0x18] sm:$0xf0]  ;;  %v1226_v49 = vld [vmem:[%s1985_s1 + $0x80] sm:$0xf]  ;;  %v1503_v50 = vld [vmem:[%s1985_s1 + $0x84] sm:$0xf0] }
  0x2b   : > { %575 = vmatpush.bf16.msra.mxu1 %v1235_v40  ;;  %v1175_v51 = vor.u32 %v1488_v46, %v1172_v48  ;;  %v1227_v52 = vor.u32 %v1503_v50, %v1226_v49  ;;  %v1502_v53 = vld [vmem:[%s1985_s1 + $0x84] sm:$0xf]  ;;  %v1228_v54 = vld [vmem:[%s1985_s1 + $0x88] sm:$0xf0]  ;;  %v1162_v55 = vld [vmem:[%s1985_s1] sm:$0xf] }
  0x2c   : > { %614 = vmatpush.bf16.msrb.mxu2 %v1263_v61  ;;  %v1231_v56 = vor.u32 %v1502_v53, %v1228_v54  ;;  %v1487_v57 = vld [vmem:[%s1985_s1 + $0x4] sm:$0xf0]  ;;  %v1486_v58 = vld [vmem:[%s1985_s1 + $0x4] sm:$0xf]  ;;  %v1164_v59 = vld [vmem:[%s1985_s1 + $0x8] sm:$0xf0] }
  0x2d   : > { %v1163_v60 = vor.u32 %v1487_v57, %v1162_v55  ;;  %v1167_v61 = vor.u32 %v1486_v58, %v1164_v59  ;;  %v1524_v62 = vld [vmem:[%s1985_s1 + $0x134] sm:$0xf]  ;;  %v1316_v0 = vld [vmem:[%s1985_s1 + $0x138] sm:$0xf0]  ;;  %v1522_v3 = vld [vmem:[%s1985_s1 + $0x124] sm:$0xf] }
  0x2e   : > { %561 = vmatpush.bf16.msra.mxu0 %v1171_v47  ;;  %603 = vmatpush.bf16.msra.mxu3 %v1175_v51  ;;  %v1319_v2 = vor.u32 %v1524_v62, %v1316_v0  ;;  %v1308_v4 = vld [vmem:[%s1985_s1 + $0x128] sm:$0xf0]  ;;  %v1520_v6 = vld [vmem:[%s1985_s1 + $0x114] sm:$0xf]  ;;  %v1300_v7 = vld [vmem:[%s1985_s1 + $0x118] sm:$0xf0] }
  0x2f   : > { %576 = vmatpush.bf16.msra.mxu1 %v1227_v52  ;;  %v1311_v5 = vor.u32 %v1522_v3, %v1308_v4  ;;  %v1303_v8 = vor.u32 %v1520_v6, %v1300_v7  ;;  %v1518_v9 = vld [vmem:[%s1985_s1 + $0x104] sm:$0xf]  ;;  %v1292_v10 = vld [vmem:[%s1985_s1 + $0x108] sm:$0xf0]  ;;  %v1533_v14 = vld [vmem:[#allocation4 + $0x38] sm:$0xff]  ;;  %vm296_vm9 = vcmask 1046016  }
  0x30   : > { %615 = vmatpush.bf16.msrb.mxu2 %v1255_v16  ;;  %v1295_v12 = vor.u32 %v1518_v9, %v1292_v10  ;;  %v1532_v15 = vld [vmem:[#allocation4 + $0x30] sm:$0xff]  ;;  %v1531_v18 = vld [vmem:[#allocation4 + $0x28] sm:$0xff]  ;;  %v1530_v21 = vld [vmem:[#allocation4 + $0x20] sm:$0xff] }
  0x31   : > { %v1529_v26 = vld [vmem:[#allocation4 + $0x18] sm:$0xff]  ;;  %v1528_v27 = vld [vmem:[#allocation4 + $0x10] sm:$0xff]  ;;  %v1527_v29 = vld [vmem:[#allocation4 + $0x8] sm:$0xff] }
  0x32   : > { %562 = vmatpush.bf16.msra.mxu0 %v1163_v60  ;;  %604 = vmatpush.bf16.msra.mxu3 %v1167_v61  ;;  %v1541_v30 = vld [vmem:[#allocation4 + $0x78] sm:$0xff]  ;;  %v1548_v31 = vld [vmem:[#allocation4 + $0xb0] sm:$0xff]  ;;  %v1526_v32 = vld [vmem:[#allocation4] sm:$0xff] }
  0x33   : > { %1002 = vmatpush.bf16.msrb.mxu1 %v1533_v14  ;;  %v1540_v33 = vld [vmem:[#allocation4 + $0x70] sm:$0xff]  ;;  %v1547_v34 = vld [vmem:[#allocation4 + $0xa8] sm:$0xff]  ;;  %v1565_v35 = vld [vmem:[#allocation4 + $0x138] sm:$0xff] }
  0x34   : > { %616 = vmatpush.bf16.msrb.mxu2 %v1247_v28  ;;  %v1549_v28 = vld [vmem:[#allocation4 + $0xb8] sm:$0xff]  ;;  %v1546_v37 = vld [vmem:[#allocation4 + $0xa0] sm:$0xff]  ;;  %v1564_v38 = vld [vmem:[#allocation4 + $0x130] sm:$0xff] }
  0x35   : > { %v1557_v36 = vld [vmem:[#allocation4 + $0xf8] sm:$0xff]  ;;  %v1556_v39 = vld [vmem:[#allocation4 + $0xf0] sm:$0xff]  ;;  %v1538_v40 = vld [vmem:[#allocation4 + $0x60] sm:$0xff] }
  0x36   : > { %629 = vmatpush.bf16.msrb.mxu0 %v1319_v2  ;;  %1016 = vmatpush.bf16.msrb.mxu3 %v1541_v30  ;;  %v1545_v41 = vld [vmem:[#allocation4 + $0x98] sm:$0xff]  ;;  %v1563_v42 = vld [vmem:[#allocation4 + $0x128] sm:$0xff]  ;;  %v1544_v45 = vld [vmem:[#allocation4 + $0x90] sm:$0xff] }
  0x37   : > { %1003 = vmatpush.bf16.msrb.mxu1 %v1532_v15  ;;  %v1537_v44 = vld [vmem:[#allocation4 + $0x58] sm:$0xff]  ;;  %v1562_v46 = vld [vmem:[#allocation4 + $0x120] sm:$0xff]  ;;  %v1536_v48 = vld [vmem:[#allocation4 + $0x50] sm:$0xff] }
  0x38   : > { %617 = vmatpush.bf16.msrb.mxu2 %v1239_v43  ;;  %v1555_v43 = vld [vmem:[#allocation4 + $0xe8] sm:$0xff]  ;;  %v1554_v47 = vld [vmem:[#allocation4 + $0xe0] sm:$0xff]  ;;  %v1561_v50 = vld [vmem:[#allocation4 + $0x118] sm:$0xff] }
  0x39   : > { %v1543_v49 = vld [vmem:[#allocation4 + $0x88] sm:$0xff]  ;;  %v1553_v51 = vld [vmem:[#allocation4 + $0xd8] sm:$0xff]  ;;  %v1542_v53 = vld [vmem:[#allocation4 + $0x80] sm:$0xff] }
  0x3a   : > { %630 = vmatpush.bf16.msrb.mxu0 %v1311_v5  ;;  %1017 = vmatpush.bf16.msrb.mxu3 %v1540_v33  ;;  %v1535_v52 = vld [vmem:[#allocation4 + $0x48] sm:$0xff]  ;;  %v1560_v54 = vld [vmem:[#allocation4 + $0x110] sm:$0xff]  ;;  %v1558_v59 = vld [vmem:[#allocation4 + $0x100] sm:$0xff] }
  0x3b   : > { %1004 = vmatpush.bf16.msrb.mxu1 %v1531_v18  ;;  %v1552_v55 = vld [vmem:[#allocation4 + $0xd0] sm:$0xff]  ;;  %v1559_v57 = vld [vmem:[#allocation4 + $0x108] sm:$0xff]  ;;  %v1550_v60 = vld [vmem:[#allocation4 + $0xc0] sm:$0xff] }
  0x3c   : > { %618 = vmatpush.bf16.msrb.mxu2 %v1231_v56  ;;  %v1534_v56 = vld [vmem:[#allocation4 + $0x40] sm:$0xff]  ;;  %v1551_v58 = vld [vmem:[#allocation4 + $0xc8] sm:$0xff] }
  0x3d   : > { %v1589_v3 = vld [vmem:[%s1987_s3] ss:$0 sm:$0xff] }
  0x3e   : > { %631 = vmatpush.bf16.msrb.mxu0 %v1303_v8 }
  0x3f   : > { %1005 = vmatpush.bf16.msrb.mxu1 %v1530_v21 }
  0x40   : > { %1044 = vmatpush.bf16.msra.mxu2 %v1557_v36 }
  0x42   : > { %632 = vmatpush.bf16.msrb.mxu0 %v1295_v12 }
  0x43   : > { %1006 = vmatpush.bf16.msrb.mxu1 %v1529_v26 }
  0x44   : > { %1045 = vmatpush.bf16.msra.mxu2 %v1556_v39 }
  0x47   : > { %1007 = vmatpush.bf16.msrb.mxu1 %v1528_v27 }
  0x48   : > { %1046 = vmatpush.bf16.msra.mxu2 %v1555_v43  ;;  %v1590_v43 = vld [vmem:[%s1988_s4] ss:$0 sm:$0xff] }
  0x4b   : > { %1008 = vmatpush.bf16.msrb.mxu1 %v1527_v29 }
  0x4c   : > { %1047 = vmatpush.bf16.msra.mxu2 %v1554_v47 }
  0x4f   : > { %1009 = vmatpush.bf16.msrb.mxu1 %v1526_v32 }
  0x50   : > { %1048 = vmatpush.bf16.msra.mxu2 %v1553_v51 }
  0x54   : > { %1049 = vmatpush.bf16.msra.mxu2 %v1552_v55 }
  0x58   : > { %1050 = vmatpush.bf16.msra.mxu2 %v1551_v58 }
  0x5c   : > { %1051 = vmatpush.bf16.msra.mxu2 %v1550_v60 }
  0x84   : > { %v290_v1 = vpop.permute.xlu1 %289 }
  0x85   : > { %295 = vst.msk [vmem:[#allocation2 + $0x8] sm:$0xff] %vm277_vm7, %v290_v1 }
  0x87   : > { %v270_v13 = vpop.permute.xlu0 %269 }
  0x88   : > { %276 = vst.msk [vmem:[#allocation2] sm:$0xfc] %vm275_vm8, %v270_v13 }
  0x8c   : > { %v292_v16 = vpop.permute.xlu1 %291  ;;  %v304_v19 = vld [vmem:[#allocation2 + $0x8] sm:$0xff] }
  0x8d   : > { %297 = vst.msk [vmem:[#allocation2 + $0x20] sm:$0x3f] %vm296_vm9, %v292_v16 }
  0x8f   : > { %v272_v17 = vpop.permute.xlu0 %271  ;;  %v303_v23 = vld [vmem:[#allocation2] sm:$0xff] }
  0x90   : > { %278 = vst.msk [vmem:[#allocation2 + $0x18] sm:$0xff] %vm277_vm7, %v272_v17 }
  0x94   : > { %v307_v20 = vld [vmem:[#allocation2 + $0x20] sm:$0xff] }
  0x95   : > { %v310_v22 = vpack.c.bf16 %v307_v20, %v304_v19 }
  0x97   : > { %v306_v24 = vld [vmem:[#allocation2 + $0x18] sm:$0xff]  ;;  %577 = vmatmul.bf16.vlgmr.msra.gmra.mxu1 %v310_v22  ;;  %619 = vmatmul.bf16.vlgmr.msrb.gmra.mxu2 %v310_v22 }
  0x98   : > { %v309_v25 = vpack.c.bf16 %v306_v24, %v303_v23  ;;  %1058 = vmatpush.bf16.msra.mxu1 %v1565_v35 }
  0x9a   : > { %563 = vmatmul.bf16.vlgmr.msra.gmra.mxu0 %v309_v25  ;;  %605 = vmatmul.bf16.vlgmr.msra.gmra.mxu3 %v309_v25 }
  0x9b   : > { %1030 = vmatpush.bf16.msra.mxu0 %v1549_v28 }
  0x9c   : > { %1059 = vmatpush.bf16.msra.mxu1 %v1564_v38 }
  0x9f   : > { %1031 = vmatpush.bf16.msra.mxu0 %v1548_v31 }
  0xa0   : > { %1060 = vmatpush.bf16.msra.mxu1 %v1563_v42 }
  0xa3   : > { %1032 = vmatpush.bf16.msra.mxu0 %v1547_v34 }
  0xa4   : > { %1061 = vmatpush.bf16.msra.mxu1 %v1562_v46 }
  0xa7   : > { %1033 = vmatpush.bf16.msra.mxu0 %v1546_v37 }
  0xa8   : > { %1062 = vmatpush.bf16.msra.mxu1 %v1561_v50 }
  0xaa   : > { %1321 = vmatmul.msk.bf16.vlgmr.msrb.gmra.mxu0 %vm257_vm0, %v1836_v11  ;;  %v1539_v11 = vld [vmem:[#allocation4 + $0x68] sm:$0xff]  ;;  %v592_v62 = vpop.f32.mrf.mxu2 }
  0xab   : > { %1018 = vmatpush.bf16.msrb.mxu3 %v1539_v11  ;;  %1034 = vmatpush.bf16.msra.mxu0 %v1545_v41 }
  0xac   : > { %1063 = vmatpush.bf16.msra.mxu1 %v1560_v54 }
  0xaf   : > { %1019 = vmatpush.bf16.msrb.mxu3 %v1538_v40  ;;  %1035 = vmatpush.bf16.msra.mxu0 %v1544_v45 }
  0xb0   : > { %1064 = vmatpush.bf16.msra.mxu1 %v1559_v57 }
  0xb2   : > { %v594_v1 = vpop.f32.mrf.mxu2 }
  0xb3   : > { %1020 = vmatpush.bf16.msrb.mxu3 %v1537_v44  ;;  %1036 = vmatpush.bf16.msra.mxu0 %v1543_v49 }
  0xb4   : > { %1065 = vmatpush.bf16.msra.mxu1 %v1558_v59 }
  0xb7   : > { %1021 = vmatpush.bf16.msrb.mxu3 %v1536_v48  ;;  %1037 = vmatpush.bf16.msra.mxu0 %v1542_v53 }
  0xbb   : > { %1022 = vmatpush.bf16.msrb.mxu3 %v1535_v52 }
  0xbf   : > { %1023 = vmatpush.bf16.msrb.mxu3 %v1534_v56 }
 0x114   : > { %v578_v61 = vpop.f32.mrf.mxu1 }
 0x117   : > { %v564_v0 = vpop.f32.mrf.mxu0 }
 0x118   : > { %v579_v2 = vadd.f32 %v578_v61, %v564_v0 }
 0x11a   : > { %v593_v4 = vadd.f32 %v592_v62, %v579_v2  ;;  %v620_v26 = vpop.f32.mrf.mxu2 }
 0x11c   : > { %v643_v5 = vadd.f32 %v1589_v3, %v593_v4  ;;  %v580_v7 = vpop.f32.mrf.mxu1 }
 0x11e   : > { %v645_v6 = vmax.f32 %v643_v5, 0.0 }
 0x11f   : > { %v566_v8 = vpop.f32.mrf.mxu0 }
 0x120   : > { %v652_v9 = vrot.slane %v645_v6, 4  ;;  %v581_v10 = vadd.f32 %v580_v7, %v566_v8  ;;  %v677_v12 = vpack.c.bf16 %v645_v6, %v1637_v63  ;;  %v606_v63 = vpop.f32.mrf.mxu3 }
 0x121   : > { %v621_v29 = vadd.f32 %v620_v26, %v606_v63 }
 0x122   : > { %657 = vst [vmem:[#allocation3 + $0x30] sm:$0xf0] %v652_v9  ;;  %v595_v13 = vadd.f32 %v594_v1, %v581_v10  ;;  %1010 = vmatmul.bf16.vlgmr.msrb.gmra.mxu1 %v677_v12  ;;  %v622_v32 = vpop.f32.mrf.mxu2 }
 0x124   : > { %v644_v14 = vadd.f32 %v1589_v3, %v595_v13 }
 0x126   : > { %v646_v15 = vmax.f32 %v644_v14, 0.0 }
 0x127   : > { %v634_v24 = vpop.f32.mrf.mxu0 }
 0x128   : > { %v653_v16 = vrot.slane %v646_v15, 4  ;;  %v679_v17 = vpack.c.bf16 %v646_v15, %v645_v6  ;;  %v681_v21 = vpack.c.bf16 0.0, %v646_v15  ;;  %v608_v27 = vpop.f32.mrf.mxu3  ;;  %v635_v31 = vadd.f32 %v634_v24, %v621_v29 }
 0x129   : > { %v668_v18 = vld [vmem:[#allocation3 + $0x30] sm:$0xff]  ;;  %v623_v11 = vadd.f32 %v622_v32, %v608_v27 }
 0x12a   : > { %v654_v19 = vsel %vm249_vm6, %v652_v9, %v653_v16  ;;  %664 = vst [vmem:[#allocation3 + $0x28] sm:$0xf] %v653_v16  ;;  %1038 = vmatmul.bf16.vlgmr.msra.gmra.mxu0 %v679_v17 }
 0x12b   : > { %v678_v20 = vpack.c.bf16 %v654_v19, %v668_v18 }
 0x12d   : > { %1024 = vmatmul.bf16.vlgmr.msrb.gmra.mxu3 %v678_v20 }
 0x12f   : > { %v636_v28 = vpop.f32.mrf.mxu0 }
 0x130   : > { %v637_v37 = vadd.f32 %v636_v28, %v623_v11 }
 0x131   : > { %v675_v22 = vld [vmem:[#allocation3 + $0x28] sm:$0xff] }
 0x132   : > { %v680_v23 = vpack.c.bf16 %v675_v22, %v654_v19  ;;  %1066 = vmatmul.bf16.vlgmr.msra.gmra.mxu1 %v681_v21 }
 0x134   : > { %1052 = vmatmul.bf16.vlgmr.msra.gmra.mxu2 %v680_v23 }
 0x19f   : > { %v1011_v25 = vpop.f32.mrf.mxu1 }
 0x1a0   : > { %v1012_v33 = vadd.f32 %v1011_v25, %v635_v31 }
 0x1a7   : > { %v1013_v30 = vpop.f32.mrf.mxu1  ;;  %v1039_v36 = vpop.f32.mrf.mxu0 }
 0x1a8   : > { %v1014_v41 = vadd.f32 %v1013_v30, %v637_v37 }
 0x1af   : > { %v1067_v39 = vpop.f32.mrf.mxu1  ;;  %v1041_v48 = vpop.f32.mrf.mxu0 }
 0x1b0   : > { %v1025_v34 = vpop.f32.mrf.mxu3 }
 0x1b1   : > { %v1026_v35 = vadd.f32 %v1025_v34, %v1012_v33 }
 0x1b3   : > { %v1040_v38 = vadd.f32 %v1039_v36, %v1026_v35 }
 0x1b7   : > { %v1053_v40 = vpop.f32.mrf.mxu2  ;;  %v1069_v53 = vpop.f32.mrf.mxu1 }
 0x1b8   : > { %v1054_v42 = vadd.f32 %v1053_v40, %v1040_v38  ;;  %v1027_v44 = vpop.f32.mrf.mxu3 }
 0x1b9   : > { %v1028_v46 = vadd.f32 %v1027_v44, %v1014_v41 }
 0x1ba   : > { %v1068_v45 = vadd.f32 %v1067_v39, %v1054_v42 }
 0x1bb   : > { %v1042_v50 = vadd.f32 %v1041_v48, %v1028_v46 }
 0x1bc   : > { %v1076_v47 = vadd.f32 %v1590_v43, %v1068_v45 }
 0x1be   : > { %v1078_v49 = vmax.f32 %v1076_v47, 0.0 }
 0x1bf   : > { %v1055_v51 = vpop.f32.mrf.mxu2 }
 0x1c0   : > { %1080 = vst [vmem:[%s241_s26] sm:$0xff] %v1078_v49  ;;  %v1056_v52 = vadd.f32 %v1055_v51, %v1042_v50 }
 0x1c2   : > { %v1070_v54 = vadd.f32 %v1069_v53, %v1056_v52 }
 0x1c4   : > { %v1077_v55 = vadd.f32 %v1590_v43, %v1070_v54 }
 0x1c6   : > { %v1079_v56 = vmax.f32 %v1077_v55, 0.0 }
 0x1c8   : > { %1081 = vst [vmem:[%s241_s26 + $0x8] sm:$0xff] %v1079_v56 }
 0x1c9 PF: > { %s16_s18 = sadd.s32 1, %s1631_s18  }
 0x1ca   : > { %p13_p7 = scmp.ge.s32.totalorder %s16_s18, 4  }
 0x1cc   :  { %15 = sbr.rel (!%p13_p7) target bundleno = 1 (0x1), region = 75 }
 0x1d1   :  { %1103 = vsyncpa [#allocation5], 1 }
 0x1d2   :  { %1105 = vsyncpa [#allocation5 + $0x1], 1 }

</bundles_post_ra>
